<compile_context>
chip_gen: v6e
topology: v6e:2x2x1
jax: 0.10.0
libtpu: 0.0.40
codegen_flags: <defaults>
</compile_context>

<pallas_src>
import functools

import jax
import jax.numpy as jnp
from jax import lax
from jax.experimental import pallas as pl
from jax.experimental.pallas import tpu as pltpu

_LANES = 128                      # vreg lane width
_SUBROW_SPLIT = 8                 # split each batch row into 8 sub-rows
_TN_CAP = 8192                    # max feature-tile width
_VMEM_INPUT_BUDGET = 12 * 1024 * 1024   # 2 inputs x 2 pipeline buffers budget


def _round_up(x, m):
    return ((x + m - 1) // m) * m


def _dice_partial_kernel(p_ref, t_ref, num_ref, den_ref, *, n_chunks, unroll):
    # Grid: (parallel feature-partition, feature tiles).  Axis 1 is the
    # reduction axis; outputs are resident accumulators across it.
    k = pl.program_id(1)

    @pl.when(k == 0)
    def _():
        num_ref[...] = jnp.zeros(num_ref.shape, num_ref.dtype)
        den_ref[...] = jnp.zeros(den_ref.shape, den_ref.dtype)

    def body(j, carry):
        num, den = carry
        start = pl.multiple_of(j * _LANES, _LANES)
        pc = p_ref[:, pl.ds(start, _LANES)].astype(jnp.float32)
        tc = t_ref[:, pl.ds(start, _LANES)].astype(jnp.float32)
        # Pure VPU work: no cross-lane reduce on the loop-carried path.
        return num + pc * tc, den + (pc + tc)

    num, den = lax.fori_loop(0, n_chunks, body,
                             (num_ref[0], den_ref[0]), unroll=unroll)
    num_ref[0] = num
    den_ref[0] = den


def binary_dice_loss(predict, target, smooth=1, p=2, reduction='mean'):
    """Pallas implementation of BinaryDiceLoss.forward."""
    assert predict.shape[0] == target.shape[0], "batch size mismatch"
    del p, reduction  # unused in the reference forward pass

    B = predict.shape[0]
    pred2d = predict.reshape(B, -1)
    targ2d = target.reshape(B, -1)
    N = pred2d.shape[1]

    # --- sublane packing: view each batch row as 8 sub-rows -----------------
    R = _SUBROW_SPLIT
    b_rows = B * R
    m_raw = -(-N // R)                       # ceil(N / R)

    # --- tile width from VMEM budget (v7x-safe), multiple of 128 ------------
    itemsize = max(jnp.dtype(pred2d.dtype).itemsize,
                   jnp.dtype(targ2d.dtype).itemsize)
    tn_budget = _VMEM_INPUT_BUDGET // (b_rows * itemsize * 2 * 2)
    tn_budget = max(_LANES, (tn_budget // _LANES) * _LANES)
    tn = min(tn_budget, _TN_CAP, _round_up(m_raw, _LANES))

    # --- parallel partition of the feature axis (megacore on v7x) -----------
    k_raw = -(-m_raw // tn)
    P = 2 if k_raw >= 2 else 1
    M = _round_up(m_raw, P * tn)
    K = M // (P * tn)
    n_pad = R * M

    if n_pad != N:
        pred2d = jnp.pad(pred2d, ((0, 0), (0, n_pad - N)))
        targ2d = jnp.pad(targ2d, ((0, 0), (0, n_pad - N)))
    pred_rows = pred2d.reshape(b_rows, M)
    targ_rows = targ2d.reshape(b_rows, M)

    n_chunks = tn // _LANES
    kernel = functools.partial(_dice_partial_kernel,
                               n_chunks=n_chunks,
                               unroll=min(8, n_chunks))

    num_part, den_part = pl.pallas_call(
        kernel,
        out_shape=(
            jax.ShapeDtypeStruct((P, b_rows, _LANES), jnp.float32),
            jax.ShapeDtypeStruct((P, b_rows, _LANES), jnp.float32),
        ),
        grid_spec=pltpu.PrefetchScalarGridSpec(
            num_scalar_prefetch=0,
            grid=(P, K),
            in_specs=[
                pl.BlockSpec((b_rows, tn), lambda pb, kb: (0, pb * K + kb)),
                pl.BlockSpec((b_rows, tn), lambda pb, kb: (0, pb * K + kb)),
            ],
            out_specs=[
                pl.BlockSpec((1, b_rows, _LANES), lambda pb, kb: (pb, 0, 0)),
                pl.BlockSpec((1, b_rows, _LANES), lambda pb, kb: (pb, 0, 0)),
            ],
        ),
        compiler_params=pltpu.CompilerParams(
            dimension_semantics=("parallel", "arbitrary"),
            vmem_limit_bytes=32 * 1024 * 1024,
        ),
    )(pred_rows, targ_rows)

    # Tiny epilogue in plain JAX: collapse lane partials, parallel partitions
    # and the 8 sub-rows back to per-batch sums, then finish the dice loss.
    num = num_part.sum(axis=(0, 2)).reshape(B, R).sum(axis=1)
    den = den_part.sum(axis=(0, 2)).reshape(B, R).sum(axis=1) + jnp.float32(smooth)
    dice = 2.0 * num / den
    return (1.0 - jnp.mean(dice)).astype(jnp.float32)


def _reference(predict, target, smooth=1):
    B = predict.shape[0]
    pred2d = predict.reshape(B, -1).astype(jnp.float32)
    targ2d = target.reshape(B, -1).astype(jnp.float32)
    num = jnp.sum(pred2d * targ2d, axis=1)
    den = jnp.sum(pred2d, axis=1) + jnp.sum(targ2d, axis=1) + smooth
    dice = 2.0 * num / den
    return 1.0 - jnp.mean(dice)


if __name__ == "__main__":
    key = jax.random.PRNGKey(0)
    k1, k2 = jax.random.split(key)
    # NCHW inputs, small shapes: batch=2, channels=4, spatial=16
    predict = jax.nn.sigmoid(jax.random.normal(k1, (2, 4, 16, 16), jnp.float32))
    target = (jax.random.uniform(k2, (2, 4, 16, 16)) > 0.5).astype(jnp.float32)

    loss = binary_dice_loss(predict, target, smooth=1, p=2, reduction='mean')
    loss = jax.block_until_ready(loss)

    ref = _reference(predict, target, smooth=1)
    assert jnp.allclose(loss, ref, atol=1e-5, rtol=1e-5), (loss, ref)
    print("KERNEL_OK")
</pallas_src>

<mosaic_0001>
module attributes {stable_mosaic.version = 11 : i64} {
  func.func @_dice_partial_kernel(%arg0: i32, %arg1: i32, %arg2: memref<16x128xf32, #tpu.memory_space<vmem>>, %arg3: memref<16x128xf32, #tpu.memory_space<vmem>>, %arg4: memref<1x16x128xf32, #tpu.memory_space<vmem>>, %arg5: memref<1x16x128xf32, #tpu.memory_space<vmem>>) attributes {dimension_semantics = [#tpu.dimension_semantics<parallel>, #tpu.dimension_semantics<arbitrary>], iteration_bounds = array<i64: 1, 1>, scalar_prefetch = 0 : i64, scratch_operands = 0 : i64, tpu.core_type = #tpu.core_type<tc>, window_params = [{transform_indices = @transform_0, window_bounds = array<i64: 16, 128>}, {transform_indices = @transform_1, window_bounds = array<i64: 16, 128>}, {transform_indices = @transform_2, window_bounds = array<i64: 1, 16, 128>}, {transform_indices = @transform_3, window_bounds = array<i64: 1, 16, 128>}]} {
    %c0_i32 = arith.constant 0 : i32
    %0 = arith.cmpi eq, %arg1, %c0_i32 : i32
    %1 = arith.extui %0 : i1 to i32
    %c0_i32_0 = arith.constant 0 : i32
    %2 = arith.cmpi ne, %1, %c0_i32_0 : i32
    scf.if %2 {
      %cst = arith.constant 0.000000e+00 : f32
      %23 = vector.broadcast %cst : f32 to vector<1x16x128xf32>
      %c0_15 = arith.constant 0 : index
      %c0_16 = arith.constant 0 : index
      %c0_17 = arith.constant 0 : index
      %24 = vector.load %arg4[%c0_15, %c0_16, %c0_17] : memref<1x16x128xf32, #tpu.memory_space<vmem>>, vector<1x16x128xf32>
      tpu.vector_store %arg4[%c0_15, %c0_16, %c0_17], %23 {strides = array<i32>} : memref<1x16x128xf32, #tpu.memory_space<vmem>>, vector<1x16x128xf32>,
      %cst_18 = arith.constant 0.000000e+00 : f32
      %25 = vector.broadcast %cst_18 : f32 to vector<1x16x128xf32>
      %c0_19 = arith.constant 0 : index
      %c0_20 = arith.constant 0 : index
      %c0_21 = arith.constant 0 : index
      %26 = vector.load %arg5[%c0_19, %c0_20, %c0_21] : memref<1x16x128xf32, #tpu.memory_space<vmem>>, vector<1x16x128xf32>
      tpu.vector_store %arg5[%c0_19, %c0_20, %c0_21], %25 {strides = array<i32>} : memref<1x16x128xf32, #tpu.memory_space<vmem>>, vector<1x16x128xf32>,
    } else {
    }
    %c0 = arith.constant 0 : index
    %c0_1 = arith.constant 0 : index
    %c0_2 = arith.constant 0 : index
    %3 = vector.load %arg4[%c0, %c0_1, %c0_2] : memref<1x16x128xf32, #tpu.memory_space<vmem>>, vector<1x16x128xf32>
    %4 = vector.shape_cast %3 : vector<1x16x128xf32> to vector<16x128xf32>
    %c0_3 = arith.constant 0 : index
    %c0_4 = arith.constant 0 : index
    %c0_5 = arith.constant 0 : index
    %5 = vector.load %arg5[%c0_3, %c0_4, %c0_5] : memref<1x16x128xf32, #tpu.memory_space<vmem>>, vector<1x16x128xf32>
    %6 = vector.shape_cast %5 : vector<1x16x128xf32> to vector<16x128xf32>
    %c0_i32_6 = arith.constant 0 : i32
    %c128_i32 = arith.constant 128 : i32
    %7 = arith.muli %c0_i32_6, %c128_i32 : i32
    %8 = tpu.assume_multiple %7, 128 : i32
    %c0_7 = arith.constant 0 : index
    %9 = arith.index_cast %8 : i32 to index
    %10 = vector.load %arg2[%c0_7, %9] : memref<16x128xf32, #tpu.memory_space<vmem>>, vector<16x128xf32>
    %c0_8 = arith.constant 0 : index
    %11 = arith.index_cast %8 : i32 to index
    %12 = vector.load %arg3[%c0_8, %11] : memref<16x128xf32, #tpu.memory_space<vmem>>, vector<16x128xf32>
    %13 = arith.mulf %10, %12 : vector<16x128xf32>
    %14 = arith.addf %4, %13 : vector<16x128xf32>
    %15 = arith.addf %10, %12 : vector<16x128xf32>
    %16 = arith.addf %6, %15 : vector<16x128xf32>
    %c1_i32 = arith.constant 1 : i32
    %c0_9 = arith.constant 0 : index
    %c0_10 = arith.constant 0 : index
    %c0_11 = arith.constant 0 : index
    %17 = vector.load %arg4[%c0_9, %c0_10, %c0_11] : memref<1x16x128xf32, #tpu.memory_space<vmem>>, vector<1x16x128xf32>
    %18 = vector.shape_cast %17 : vector<1x16x128xf32> to vector<16x128xf32>
    %19 = vector.shape_cast %14 : vector<16x128xf32> to vector<1x16x128xf32>
    tpu.vector_store %arg4[%c0_9, %c0_10, %c0_11], %19 {strides = array<i32>} : memref<1x16x128xf32, #tpu.memory_space<vmem>>, vector<1x16x128xf32>,
    %c0_12 = arith.constant 0 : index
    %c0_13 = arith.constant 0 : index
    %c0_14 = arith.constant 0 : index
    %20 = vector.load %arg5[%c0_12, %c0_13, %c0_14] : memref<1x16x128xf32, #tpu.memory_space<vmem>>, vector<1x16x128xf32>
    %21 = vector.shape_cast %20 : vector<1x16x128xf32> to vector<16x128xf32>
    %22 = vector.shape_cast %16 : vector<16x128xf32> to vector<1x16x128xf32>
    tpu.vector_store %arg5[%c0_12, %c0_13, %c0_14], %22 {strides = array<i32>} : memref<1x16x128xf32, #tpu.memory_space<vmem>>, vector<1x16x128xf32>,
    return
  }
  func.func @transform_0(%arg0: i32, %arg1: i32) -> (i32, i32) {
    %c1_i32 = arith.constant 1 : i32
    %0 = arith.muli %arg0, %c1_i32 : i32
    %1 = arith.addi %0, %arg1 : i32
    %c0_i32 = arith.constant 0 : i32
    %c0_i32_0 = arith.constant 0 : i32
    return %c0_i32, %1 : i32, i32
  }
  func.func @transform_1(%arg0: i32, %arg1: i32) -> (i32, i32) {
    %c1_i32 = arith.constant 1 : i32
    %0 = arith.muli %arg0, %c1_i32 : i32
    %1 = arith.addi %0, %arg1 : i32
    %c0_i32 = arith.constant 0 : i32
    %c0_i32_0 = arith.constant 0 : i32
    return %c0_i32, %1 : i32, i32
  }
  func.func @transform_2(%arg0: i32, %arg1: i32) -> (i32, i32, i32) {
    %c0_i32 = arith.constant 0 : i32
    %c0_i32_0 = arith.constant 0 : i32
    %c0_i32_1 = arith.constant 0 : i32
    return %arg0, %c0_i32, %c0_i32_0 : i32, i32, i32
  }
  func.func @transform_3(%arg0: i32, %arg1: i32) -> (i32, i32, i32) {
    %c0_i32 = arith.constant 0 : i32
    %c0_i32_0 = arith.constant 0 : i32
    %c0_i32_1 = arith.constant 0 : i32
    return %arg0, %c0_i32, %c0_i32_0 : i32, i32, i32
  }
}

</mosaic_0001>

<bundles_post_ra>
// kernel: tpu_custom_call.1
= control target key start
LH: loop header
LB: loop body
LE: loop exit
PB: predicated region body
PF: predicated region fallthrough
CT: control target
= control target key end

     0   :  { %9 = vsyncpa [#allocation3], 0  ;;  %s258_s0 = inlined_call_operand.hbm [shape: f32[16,128], index: 0, kind: input, shape index: {}]   ;;  %s259_s1 = inlined_call_operand.hbm [shape: f32[16,128], index: 1, kind: input, shape index: {}]   ;;  %s260_s2 = inlined_call_operand.hbm [shape: f32[1,16,128], index: 2, kind: output, shape index: {0}]   ;;  %s261_s3 = inlined_call_operand.hbm [shape: f32[1,16,128], index: 3, kind: output, shape index: {1}]  }
   0x1   :  { %10 = vsyncpa [#allocation6], 0 }
   0x2   :  { %11 = vsyncpa [#allocation4], 0 }
   0x3   :  { %12 = vsyncpa [#allocation9], 0  ;;  %s208_s12 = smov [#allocation2]  }
   0x4   :  { %s21_s13 = sshll.u32 %s208_s12, 4  ;;  %s22_s13 = int_to_ptr.vmem [resolvable:$true] %s21_s13 }
   0x5   :  { %s128_s14 = scalar_lea.vmem %s22_s13, 256  ;;  %p133_p1 = scmp.lt.s32.totalorder %s22_s13, %s22_s13 }
   0x6   :  { %p129_p0 = scmp.ne.s32.totalorder %s22_s13, %s128_s14  ;;  %p134_p2 = scmp.lt.s32.totalorder %s128_s14, %s128_s14 }
   0x8   :  { %p135_p3 = por %p134_p2, %p133_p1 }
   0xa   :  { %p136_p4 = pnand %p135_p3, %p129_p0 }
   0xc   :  { %139 = shalt.err (!%p136_p4)
}
   0xd   :  { %s209_s15 = smov 128   ;;  %s210_s16 = smov 8  }
   0xe   :  { %27 = dma.hbm_to_vmem [thread:$0]  %s258_s0, 256, %s22_s13, [#allocation3], %s209_s15, %s209_s15, %s210_s16  }
   0xf   :  { %s211_s19 = smov [#allocation5]  }
  0x10   :  { %s36_s20 = sshll.u32 %s211_s19, 4  ;;  %s37_s20 = int_to_ptr.vmem [resolvable:$true] %s36_s20 }
  0x11   :  { %s148_s21 = scalar_lea.vmem %s37_s20, 256  ;;  %p153_p6 = scmp.lt.s32.totalorder %s37_s20, %s37_s20 }
  0x12   :  { %p149_p5 = scmp.ne.s32.totalorder %s37_s20, %s148_s21  ;;  %p154_p7 = scmp.lt.s32.totalorder %s148_s21, %s148_s21 }
  0x14   :  { %p155_p8 = por %p154_p7, %p153_p6 }
  0x16   :  { %p156_p9 = pnand %p155_p8, %p149_p5 }
  0x18   :  { %159 = shalt.err (!%p156_p9)
}
  0x19   :  { %42 = dma.hbm_to_vmem [thread:$0]  %s259_s1, 256, %s37_s20, [#allocation6], %s209_s15, %s209_s15, %s210_s16  }
  0x1a   :  { %200 = dma.done.wait [#allocation3], 256  }
  0x1b   :  { %201 = vsyncadd [#allocation3], 4294967040 }
  0x1c   :  { %202 = dma.done.wait [#allocation6], 256  }
  0x1d   :  { %203 = vsyncadd [#allocation6], 4294967040  ;;  %v63_v0 = vld [vmem:[#allocation2] sm:$0xff]  ;;  %v65_v1 = vld [vmem:[#allocation5] sm:$0xff]  ;;  %s212_s0 = smov [#allocation7]   ;;  %s213_s25 = smov [#allocation8]  }
  0x1e   :  { %v64_v2 = vld [vmem:[#allocation2 + $0x8] sm:$0xff]  ;;  %v67_v3 = vmul.f32 %v65_v1, %v63_v0  ;;  %v66_v4 = vld [vmem:[#allocation5 + $0x8] sm:$0xff]  ;;  %v71_v5 = vadd.f32 %v65_v1, %v63_v0  ;;  %s84_s24 = sshll.u32 %s212_s0, 4  ;;  %s96_s26 = sshll.u32 %s213_s25, 4  ;;  %s85_s24 = int_to_ptr.vmem [resolvable:$true] %s84_s24  ;;  %s97_s26 = int_to_ptr.vmem [resolvable:$true] %s96_s26 }
  0x1f   :  { %v68_v6 = vmul.f32 %v66_v4, %v64_v2  ;;  %v72_v7 = vadd.f32 %v66_v4, %v64_v2  ;;  %s160_s1 = scalar_lea.vmem %s85_s24, 256  ;;  %p165_p11 = scmp.lt.s32.totalorder %s85_s24, %s85_s24 }
  0x20   :  { %75 = vst [vmem:[#allocation7] sm:$0xff] %v67_v3  ;;  %77 = vst [vmem:[#allocation8] sm:$0xff] %v71_v5  ;;  %p161_p10 = scmp.ne.s32.totalorder %s85_s24, %s160_s1  ;;  %p166_p12 = scmp.lt.s32.totalorder %s160_s1, %s160_s1 }
  0x21   :  { %76 = vst [vmem:[#allocation7 + $0x8] sm:$0xff] %v68_v6  ;;  %78 = vst [vmem:[#allocation8 + $0x8] sm:$0xff] %v72_v7 }
  0x22   :  { %p167_p13 = por %p166_p12, %p165_p11 }
  0x24   :  { %p168_p0 = pnand %p167_p13, %p161_p10 }
  0x26   :  { %171 = shalt.err (!%p168_p0)
}
  0x27   :  { %90 = dma.vmem_to_hbm [thread:$0]  %s85_s24, 256, %s260_s2, [#allocation4], %s209_s15, %s209_s15, %s210_s16  }
  0x28   :  { %s180_s29 = scalar_lea.vmem %s97_s26, 256  ;;  %p185_p2 = scmp.lt.s32.totalorder %s97_s26, %s97_s26 }
  0x29   :  { %p181_p1 = scmp.ne.s32.totalorder %s97_s26, %s180_s29  ;;  %p186_p3 = scmp.lt.s32.totalorder %s180_s29, %s180_s29 }
  0x2b   :  { %p187_p4 = por %p186_p3, %p185_p2 }
  0x2d   :  { %p188_p5 = pnand %p187_p4, %p181_p1 }
  0x2f   :  { %191 = shalt.err (!%p188_p5)
}
  0x30   :  { %102 = dma.vmem_to_hbm [thread:$0]  %s97_s26, 256, %s261_s3, [#allocation9], %s209_s15, %s209_s15, %s210_s16  }
  0x31   :  { %204 = dma.done.wait [#allocation4], 256  }
  0x32   :  { %205 = vsyncadd [#allocation4], 4294967040 }
  0x33   :  { %206 = dma.done.wait [#allocation9], 256  }
  0x34   :  { %207 = vsyncadd [#allocation9], 4294967040 }
  0x35   :  { %109 = vsyncpa [#allocation3], 1 }
  0x36   :  { %110 = vsyncpa [#allocation6], 1 }
  0x37   :  { %111 = vsyncpa [#allocation4], 1 }
  0x38   :  { %112 = vsyncpa [#allocation9], 1 }

</bundles_post_ra>
